<compile_context>
chip_gen: v7x
topology: tpu7x:2x2x1
jax: 0.10.0
libtpu: 0.0.40
codegen_flags: <defaults>
</compile_context>

<pallas_src>
import functools

import jax
import jax.numpy as jnp
from jax import lax
from jax.experimental import pallas as pl
from jax.experimental.pallas import tpu as pltpu


def _round_up(n, m):
    return (n + m - 1) // m * m


def _rnn_bidir_kernel(x_ref, h0_ref, wi_ref, b_ref, wh_ref, out_ref, work_ref,
                      *, hidden_size, split_directions):
    """One batch tile of the fused bidirectional Elman RNN (mode='sum').

    x_ref   : (T, TB, E)   compute dtype -- time-major input tile
    h0_ref  : (TB, 2H)     compute dtype -- [h0 | h0]
    wi_ref  : (E, 2H)      compute dtype -- [W_if | W_ib]
    b_ref   : (1, 2H)      f32           -- [b_if + b_hf | b_ib + b_hb]
    wh_ref  : (2H, 2H) block-diag, or (2, H, H) stacked when split_directions
    out_ref : (TB, T*H)    f32           -- lane-dense output slab
    work_ref: (T, TB, 2H)  compute dtype VMEM scratch, reused in-place:
              before the loop: slot i = [proj_f(i) | proj_b(T-1-i)]
              after step i   : slot i = [h_f(i)    | h_b(T-1-i)]
    """
    T, TB, E = x_ref.shape
    H = hidden_size
    cdt = work_ref.dtype

    # ---- one MXU matmul projects ALL timesteps for BOTH directions,
    #      recurrent biases folded in ----------------------------------------
    x2d = x_ref[...].reshape(T * TB, E)
    proj = (jnp.dot(x2d, wi_ref[...], preferred_element_type=jnp.float32)
            + b_ref[...]).reshape(T, TB, 2 * H)

    # Stash projections with the backward half already time-reversed, so the
    # recurrence does one dense (TB, 2H) load per step and no per-step select.
    for t in range(T):
        work_ref[t] = jnp.concatenate(
            [proj[t, :, :H], proj[T - 1 - t, :, H:]], axis=-1).astype(cdt)

    # ---- fused forward/backward recurrence ----------------------------------
    # Step i advances forward time t=i and backward time T-1-i with one
    # (TB,2H)x(2H,2H) block-diagonal dot (or two (TB,H)x(H,H) dots when 2H is
    # larger than an MXU tile) and one tanh.  State is carried in the compute
    # dtype so there is no cast on the serial critical path.
    def step(i, h):
        p = work_ref[i].astype(jnp.float32)
        if split_directions:
            zf = jnp.dot(h[:, :H], wh_ref[0], preferred_element_type=jnp.float32)
            zb = jnp.dot(h[:, H:], wh_ref[1], preferred_element_type=jnp.float32)
            z = jnp.concatenate([zf, zb], axis=-1)
        else:
            z = jnp.dot(h, wh_ref[...], preferred_element_type=jnp.float32)
        h_new = jnp.tanh(p + z).astype(cdt)
        work_ref[i] = h_new            # slot i's projection is dead; reuse it
        return h_new

    # TODO(synk): for very long T, hold wh in the MXU across all steps via
    # pltpu.matmul_push_rhs / matmul_acc_lhs / matmul_pop.
    lax.fori_loop(0, T, step, h0_ref[...], unroll=min(T, 8))

    # ---- mode='sum': assemble and write one lane-dense (TB, T*H) slab -------
    # TODO(synk): for very long T, emit this per time-tile instead of one slab.
    pieces = []
    for t in range(T):
        hf = work_ref[t, :, :H].astype(jnp.float32)          # fwd state, time t
        hb = work_ref[T - 1 - t, :, H:].astype(jnp.float32)  # bwd state, time t
        pieces.append(hf + hb)
    out_ref[...] = jnp.concatenate(pieces, axis=-1)


def _pick_batch_tile(B, T, E, H, itemsize, sublane, vmem_budget=12 << 20):
    """Largest sublane-aligned batch tile whose resident VMEM fits the budget."""
    per_row = (2 * T * E * itemsize          # x block, double-buffered
               + 2 * T * H * 4               # output block, double-buffered
               + T * 2 * H * itemsize        # work scratch (proj/state reuse)
               + 2 * H * itemsize)           # carried state
    tb = max(sublane, (vmem_budget // max(per_row, 1)) // sublane * sublane)
    return max(sublane, min(tb, _round_up(B, sublane), 512))


def rnn_layer_sum(x, hidden, params, *, compute_dtype=jnp.float32,
                  split_directions=None, batch_tile=None):
    """x: (B, T, E) f32, hidden: (B, H) f32. Returns (out (B, T, H), hidden)."""
    B, T, E = x.shape
    H = hidden.shape[-1]
    cdt = compute_dtype
    itemsize = jnp.dtype(cdt).itemsize
    sublane = 16 if cdt == jnp.bfloat16 else 8   # bf16 packs 16 sublanes/vreg
    if split_directions is None:
        split_directions = (2 * H) > 256          # past one MXU tile, no block-diag

    # ---- fuse / fold the weights once, outside the kernel -------------------
    wi = jnp.concatenate([params["w_if"], params["w_ib"]], axis=1)          # (E, 2H)
    bias = jnp.concatenate([params["b_if"] + params["b_hf"],
                            params["b_ib"] + params["b_hb"]], axis=1)       # (1, 2H)
    if split_directions:
        wh = jnp.stack([params["w_hf"], params["w_hb"]], axis=0)            # (2, H, H)
    else:
        wh = jnp.zeros((2 * H, 2 * H), jnp.float32)
        wh = wh.at[:H, :H].set(params["w_hf"]).at[H:, H:].set(params["w_hb"])

    # ---- batch tiling / padding ---------------------------------------------
    TB = batch_tile if batch_tile is not None else _pick_batch_tile(
        B, T, E, H, itemsize, sublane)
    TB = _round_up(TB, sublane)
    Bp = _round_up(B, TB)
    n_tiles = Bp // TB

    xp, h0 = x, hidden
    if Bp != B:
        xp = jnp.pad(x, ((0, Bp - B), (0, 0), (0, 0)))
        h0 = jnp.pad(hidden, ((0, Bp - B), (0, 0)))
    xp = jnp.transpose(xp, (1, 0, 2)).astype(cdt)            # (T, Bp, E) time-major
    h0c = jnp.concatenate([h0, h0], axis=1).astype(cdt)      # (Bp, 2H)
    wi = wi.astype(cdt)
    wh = wh.astype(cdt)                                      # bias stays f32

    kernel = functools.partial(_rnn_bidir_kernel, hidden_size=H,
                               split_directions=split_directions)

    out_slab = pl.pallas_call(
        kernel,
        out_shape=jax.ShapeDtypeStruct((Bp, T * H), jnp.float32),
        grid=(n_tiles,),
        in_specs=[
            pl.BlockSpec((T, TB, E), lambda b: (0, b, 0)),       # x tile
            pl.BlockSpec((TB, 2 * H), lambda b: (b, 0)),         # h0 tile
            pl.BlockSpec(wi.shape, lambda b: (0,) * wi.ndim),    # weights (resident)
            pl.BlockSpec(bias.shape, lambda b: (0,) * bias.ndim),
            pl.BlockSpec(wh.shape, lambda b: (0,) * wh.ndim),
        ],
        out_specs=pl.BlockSpec((TB, T * H), lambda b: (b, 0)),
        scratch_shapes=[pltpu.VMEM((T, TB, 2 * H), cdt)],        # proj/state reuse
        compiler_params=pltpu.CompilerParams(
            dimension_semantics=("parallel",),                   # megacore over batch
            vmem_limit_bytes=32 * 1024 * 1024),                  # safe on v5e/v6e/v7x
    )(xp, h0c, wi, bias, wh)

    out = out_slab.reshape(Bp, T, H)[:B]
    # mode == 'sum' path of the PyTorch module returns the ORIGINAL hidden state.
    return out, hidden


def _init_params(key, input_size, hidden_size):
    # nn.Linear-shaped params, stored transposed as (in, out); biases (1, out).
    ks = jax.random.split(key, 8)
    s_i = 1.0 / jnp.sqrt(jnp.float32(input_size))
    s_h = 1.0 / jnp.sqrt(jnp.float32(hidden_size))
    u = lambda k, shape, s: jax.random.uniform(k, shape, jnp.float32, -s, s)
    return {
        "w_if": u(ks[0], (input_size, hidden_size), s_i),
        "b_if": u(ks[1], (1, hidden_size), s_i),
        "w_hf": u(ks[2], (hidden_size, hidden_size), s_h),
        "b_hf": u(ks[3], (1, hidden_size), s_h),
        "w_ib": u(ks[4], (input_size, hidden_size), s_i),
        "b_ib": u(ks[5], (1, hidden_size), s_i),
        "w_hb": u(ks[6], (hidden_size, hidden_size), s_h),
        "b_hb": u(ks[7], (1, hidden_size), s_h),
    }


def _reference(x, hidden, p):
    # Pure-JAX reference mirroring the PyTorch forward (mode='sum').
    B, T, E = x.shape
    H = hidden.shape[-1]
    out_f = jnp.zeros((B, T, H), jnp.float32)
    h = hidden
    for t in range(T):
        h = jnp.tanh(x[:, t, :] @ p["w_if"] + p["b_if"]
                     + h @ p["w_hf"] + p["b_hf"])
        out_f = out_f.at[:, t, :].set(h)
    out_b = jnp.zeros((B, T, H), jnp.float32)
    h = hidden
    for t in reversed(range(T)):
        h = jnp.tanh(x[:, t, :] @ p["w_ib"] + p["b_ib"]
                     + h @ p["w_hb"] + p["b_hb"])
        out_b = out_b.at[:, t, :].set(h)
    return out_f + out_b, hidden


if __name__ == "__main__":
    B, T, E, H = 2, 8, 16, 32

    key = jax.random.PRNGKey(0)
    k_x, k_h, k_p = jax.random.split(key, 3)

    x = jax.random.normal(k_x, (B, T, E), jnp.float32)
    hidden0 = jnp.zeros((B, H), jnp.float32)   # init_zero_hidden
    params = _init_params(k_p, E, H)

    ref_out, ref_h = _reference(x, hidden0, params)

    # 1) f32 compute path, fused block-diagonal recurrence (exact check).
    f32_fn = jax.jit(functools.partial(rnn_layer_sum, params=params,
                                       compute_dtype=jnp.float32))
    out, h_ret = f32_fn(x, hidden0)
    out = jax.block_until_ready(out)
    assert out.shape == (B, T, H)
    assert jnp.allclose(out, ref_out, atol=2e-5, rtol=2e-5), "f32 mismatch vs reference"
    assert jnp.allclose(h_ret, ref_h), "hidden mismatch"

    # 2) bf16 MXU operands + bf16 carried state / scratch (all generations'
    #    MXUs are bf16-native; adds/tanh accumulate in f32).
    bf16_fn = jax.jit(functools.partial(rnn_layer_sum, params=params,
                                        compute_dtype=jnp.bfloat16))
    out_bf, _ = bf16_fn(x, hidden0)
    out_bf = jax.block_until_ready(out_bf)
    assert jnp.allclose(out_bf, ref_out, atol=5e-2, rtol=5e-2), "bf16 mismatch vs reference"

    # 3) Split-direction recurrence path (used automatically when 2H > 256)
    #    plus a multi-tile batch grid with padding (B=20, TB=8 -> 3 tiles).
    B2 = 20
    x2 = jax.random.normal(jax.random.PRNGKey(1), (B2, T, E), jnp.float32)
    hid2 = jnp.zeros((B2, H), jnp.float32)
    ref2, _ = _reference(x2, hid2, params)
    split_fn = jax.jit(functools.partial(rnn_layer_sum, params=params,
                                         compute_dtype=jnp.float32,
                                         split_directions=True, batch_tile=8))
    out2, _ = split_fn(x2, hid2)
    out2 = jax.block_until_ready(out2)
    assert out2.shape == (B2, T, H)
    assert jnp.allclose(out2, ref2, atol=2e-5, rtol=2e-5), "split/grid mismatch vs reference"

    print("KERNEL_OK")
</pallas_src>

<mosaic_0001>
module attributes {stable_mosaic.version = 11 : i64} {
  func.func @_rnn_bidir_kernel(%arg0: i32, %arg1: memref<8x8x16xf32, #tpu.memory_space<vmem>>, %arg2: memref<8x64xf32, #tpu.memory_space<vmem>>, %arg3: memref<16x64xf32, #tpu.memory_space<vmem>>, %arg4: memref<1x64xf32, #tpu.memory_space<vmem>>, %arg5: memref<64x64xf32, #tpu.memory_space<vmem>>, %arg6: memref<8x256xf32, #tpu.memory_space<vmem>>, %arg7: memref<8x8x64xf32, #tpu.memory_space<vmem>>) attributes {dimension_semantics = [#tpu.dimension_semantics<parallel>], iteration_bounds = array<i64: 1>, scalar_prefetch = 0 : i64, scratch_operands = 1 : i64, tpu.core_type = #tpu.core_type<tc>, window_params = [{transform_indices = @transform_0, window_bounds = array<i64: 8, 8, 16>}, {transform_indices = @transform_1, window_bounds = array<i64: 8, 64>}, {pipeline_mode = #tpu.pipeline_mode<synchronous>, transform_indices = @transform_2, window_bounds = array<i64: 16, 64>}, {pipeline_mode = #tpu.pipeline_mode<synchronous>, transform_indices = @transform_3, window_bounds = array<i64: 1, 64>}, {pipeline_mode = #tpu.pipeline_mode<synchronous>, transform_indices = @transform_4, window_bounds = array<i64: 64, 64>}, {transform_indices = @transform_5, window_bounds = array<i64: 8, 256>}]} {
    %c0 = arith.constant 0 : index
    %c0_0 = arith.constant 0 : index
    %c0_1 = arith.constant 0 : index
    %0 = vector.load %arg1[%c0, %c0_0, %c0_1] : memref<8x8x16xf32, #tpu.memory_space<vmem>>, vector<8x8x16xf32>
    %1 = vector.shape_cast %0 : vector<8x8x16xf32> to vector<64x16xf32>
    %c0_2 = arith.constant 0 : index
    %c0_3 = arith.constant 0 : index
    %2 = vector.load %arg3[%c0_2, %c0_3] : memref<16x64xf32, #tpu.memory_space<vmem>>, vector<16x64xf32>
    %cst = arith.constant dense<0.000000e+00> : vector<64x64xf32>
    %3 = tpu.matmul %1, %2, %cst {dimension_numbers = #tpu.dot_dimension_numbers<[1], [0], [0], [1], [0, 0, 1, 1], [], []>} : vector<64x16xf32>, vector<16x64xf32>, vector<64x64xf32> -> vector<64x64xf32>
    %c0_4 = arith.constant 0 : index
    %c0_5 = arith.constant 0 : index
    %4 = vector.load %arg4[%c0_4, %c0_5] : memref<1x64xf32, #tpu.memory_space<vmem>>, vector<1x64xf32>
    %5 = vector.broadcast %4 : vector<1x64xf32> to vector<64x64xf32>
    %6 = arith.addf %3, %5 : vector<64x64xf32>
    %7 = vector.shape_cast %6 : vector<64x64xf32> to vector<8x8x64xf32>
    %8 = vector.extract_strided_slice %7 {offsets = [0, 0, 0], sizes = [1, 8, 32], strides = [1, 1, 1]} : vector<8x8x64xf32> to vector<1x8x32xf32>
    %9 = vector.shape_cast %8 : vector<1x8x32xf32> to vector<8x32xf32>
    %10 = vector.extract_strided_slice %7 {offsets = [7, 0, 32], sizes = [1, 8, 32], strides = [1, 1, 1]} : vector<8x8x64xf32> to vector<1x8x32xf32>
    %11 = vector.shape_cast %10 : vector<1x8x32xf32> to vector<8x32xf32>
    %12 = tpu.concatenate %9, %11 in 1 : vector<8x32xf32>, vector<8x32xf32> -> vector<8x64xf32>
    %c0_6 = arith.constant 0 : index
    %c0_7 = arith.constant 0 : index
    %c0_8 = arith.constant 0 : index
    %13 = vector.load %arg7[%c0_6, %c0_7, %c0_8] : memref<8x8x64xf32, #tpu.memory_space<vmem>>, vector<1x8x64xf32>
    %14 = vector.shape_cast %13 : vector<1x8x64xf32> to vector<8x64xf32>
    %15 = vector.shape_cast %12 : vector<8x64xf32> to vector<1x8x64xf32>
    tpu.vector_store %arg7[%c0_6, %c0_7, %c0_8], %15 {strides = array<i32>} : memref<8x8x64xf32, #tpu.memory_space<vmem>>, vector<1x8x64xf32>,
    %16 = vector.extract_strided_slice %7 {offsets = [1, 0, 0], sizes = [1, 8, 32], strides = [1, 1, 1]} : vector<8x8x64xf32> to vector<1x8x32xf32>
    %17 = vector.shape_cast %16 : vector<1x8x32xf32> to vector<8x32xf32>
    %18 = vector.extract_strided_slice %7 {offsets = [6, 0, 32], sizes = [1, 8, 32], strides = [1, 1, 1]} : vector<8x8x64xf32> to vector<1x8x32xf32>
    %19 = vector.shape_cast %18 : vector<1x8x32xf32> to vector<8x32xf32>
    %20 = tpu.concatenate %17, %19 in 1 : vector<8x32xf32>, vector<8x32xf32> -> vector<8x64xf32>
    %c1 = arith.constant 1 : index
    %c0_9 = arith.constant 0 : index
    %c0_10 = arith.constant 0 : index
    %21 = vector.load %arg7[%c1, %c0_9, %c0_10] : memref<8x8x64xf32, #tpu.memory_space<vmem>>, vector<1x8x64xf32>
    %22 = vector.shape_cast %21 : vector<1x8x64xf32> to vector<8x64xf32>
    %23 = vector.shape_cast %20 : vector<8x64xf32> to vector<1x8x64xf32>
    tpu.vector_store %arg7[%c1, %c0_9, %c0_10], %23 {strides = array<i32>} : memref<8x8x64xf32, #tpu.memory_space<vmem>>, vector<1x8x64xf32>,
    %24 = vector.extract_strided_slice %7 {offsets = [2, 0, 0], sizes = [1, 8, 32], strides = [1, 1, 1]} : vector<8x8x64xf32> to vector<1x8x32xf32>
    %25 = vector.shape_cast %24 : vector<1x8x32xf32> to vector<8x32xf32>
    %26 = vector.extract_strided_slice %7 {offsets = [5, 0, 32], sizes = [1, 8, 32], strides = [1, 1, 1]} : vector<8x8x64xf32> to vector<1x8x32xf32>
    %27 = vector.shape_cast %26 : vector<1x8x32xf32> to vector<8x32xf32>
    %28 = tpu.concatenate %25, %27 in 1 : vector<8x32xf32>, vector<8x32xf32> -> vector<8x64xf32>
    %c2 = arith.constant 2 : index
    %c0_11 = arith.constant 0 : index
    %c0_12 = arith.constant 0 : index
    %29 = vector.load %arg7[%c2, %c0_11, %c0_12] : memref<8x8x64xf32, #tpu.memory_space<vmem>>, vector<1x8x64xf32>
    %30 = vector.shape_cast %29 : vector<1x8x64xf32> to vector<8x64xf32>
    %31 = vector.shape_cast %28 : vector<8x64xf32> to vector<1x8x64xf32>
    tpu.vector_store %arg7[%c2, %c0_11, %c0_12], %31 {strides = array<i32>} : memref<8x8x64xf32, #tpu.memory_space<vmem>>, vector<1x8x64xf32>,
    %32 = vector.extract_strided_slice %7 {offsets = [3, 0, 0], sizes = [1, 8, 32], strides = [1, 1, 1]} : vector<8x8x64xf32> to vector<1x8x32xf32>
    %33 = vector.shape_cast %32 : vector<1x8x32xf32> to vector<8x32xf32>
    %34 = vector.extract_strided_slice %7 {offsets = [4, 0, 32], sizes = [1, 8, 32], strides = [1, 1, 1]} : vector<8x8x64xf32> to vector<1x8x32xf32>
    %35 = vector.shape_cast %34 : vector<1x8x32xf32> to vector<8x32xf32>
    %36 = tpu.concatenate %33, %35 in 1 : vector<8x32xf32>, vector<8x32xf32> -> vector<8x64xf32>
    %c3 = arith.constant 3 : index
    %c0_13 = arith.constant 0 : index
    %c0_14 = arith.constant 0 : index
    %37 = vector.load %arg7[%c3, %c0_13, %c0_14] : memref<8x8x64xf32, #tpu.memory_space<vmem>>, vector<1x8x64xf32>
    %38 = vector.shape_cast %37 : vector<1x8x64xf32> to vector<8x64xf32>
    %39 = vector.shape_cast %36 : vector<8x64xf32> to vector<1x8x64xf32>
    tpu.vector_store %arg7[%c3, %c0_13, %c0_14], %39 {strides = array<i32>} : memref<8x8x64xf32, #tpu.memory_space<vmem>>, vector<1x8x64xf32>,
    %40 = vector.extract_strided_slice %7 {offsets = [4, 0, 0], sizes = [1, 8, 32], strides = [1, 1, 1]} : vector<8x8x64xf32> to vector<1x8x32xf32>
    %41 = vector.shape_cast %40 : vector<1x8x32xf32> to vector<8x32xf32>
    %42 = vector.extract_strided_slice %7 {offsets = [3, 0, 32], sizes = [1, 8, 32], strides = [1, 1, 1]} : vector<8x8x64xf32> to vector<1x8x32xf32>
    %43 = vector.shape_cast %42 : vector<1x8x32xf32> to vector<8x32xf32>
    %44 = tpu.concatenate %41, %43 in 1 : vector<8x32xf32>, vector<8x32xf32> -> vector<8x64xf32>
    %c4 = arith.constant 4 : index
    %c0_15 = arith.constant 0 : index
    %c0_16 = arith.constant 0 : index
    %45 = vector.load %arg7[%c4, %c0_15, %c0_16] : memref<8x8x64xf32, #tpu.memory_space<vmem>>, vector<1x8x64xf32>
    %46 = vector.shape_cast %45 : vector<1x8x64xf32> to vector<8x64xf32>
    %47 = vector.shape_cast %44 : vector<8x64xf32> to vector<1x8x64xf32>
    tpu.vector_store %arg7[%c4, %c0_15, %c0_16], %47 {strides = array<i32>} : memref<8x8x64xf32, #tpu.memory_space<vmem>>, vector<1x8x64xf32>,
    %48 = vector.extract_strided_slice %7 {offsets = [5, 0, 0], sizes = [1, 8, 32], strides = [1, 1, 1]} : vector<8x8x64xf32> to vector<1x8x32xf32>
    %49 = vector.shape_cast %48 : vector<1x8x32xf32> to vector<8x32xf32>
    %50 = vector.extract_strided_slice %7 {offsets = [2, 0, 32], sizes = [1, 8, 32], strides = [1, 1, 1]} : vector<8x8x64xf32> to vector<1x8x32xf32>
    %51 = vector.shape_cast %50 : vector<1x8x32xf32> to vector<8x32xf32>
    %52 = tpu.concatenate %49, %51 in 1 : vector<8x32xf32>, vector<8x32xf32> -> vector<8x64xf32>
    %c5 = arith.constant 5 : index
    %c0_17 = arith.constant 0 : index
    %c0_18 = arith.constant 0 : index
    %53 = vector.load %arg7[%c5, %c0_17, %c0_18] : memref<8x8x64xf32, #tpu.memory_space<vmem>>, vector<1x8x64xf32>
    %54 = vector.shape_cast %53 : vector<1x8x64xf32> to vector<8x64xf32>
    %55 = vector.shape_cast %52 : vector<8x64xf32> to vector<1x8x64xf32>
    tpu.vector_store %arg7[%c5, %c0_17, %c0_18], %55 {strides = array<i32>} : memref<8x8x64xf32, #tpu.memory_space<vmem>>, vector<1x8x64xf32>,
    %56 = vector.extract_strided_slice %7 {offsets = [6, 0, 0], sizes = [1, 8, 32], strides = [1, 1, 1]} : vector<8x8x64xf32> to vector<1x8x32xf32>
    %57 = vector.shape_cast %56 : vector<1x8x32xf32> to vector<8x32xf32>
    %58 = vector.extract_strided_slice %7 {offsets = [1, 0, 32], sizes = [1, 8, 32], strides = [1, 1, 1]} : vector<8x8x64xf32> to vector<1x8x32xf32>
    %59 = vector.shape_cast %58 : vector<1x8x32xf32> to vector<8x32xf32>
    %60 = tpu.concatenate %57, %59 in 1 : vector<8x32xf32>, vector<8x32xf32> -> vector<8x64xf32>
    %c6 = arith.constant 6 : index
    %c0_19 = arith.constant 0 : index
    %c0_20 = arith.constant 0 : index
    %61 = vector.load %arg7[%c6, %c0_19, %c0_20] : memref<8x8x64xf32, #tpu.memory_space<vmem>>, vector<1x8x64xf32>
    %62 = vector.shape_cast %61 : vector<1x8x64xf32> to vector<8x64xf32>
    %63 = vector.shape_cast %60 : vector<8x64xf32> to vector<1x8x64xf32>
    tpu.vector_store %arg7[%c6, %c0_19, %c0_20], %63 {strides = array<i32>} : memref<8x8x64xf32, #tpu.memory_space<vmem>>, vector<1x8x64xf32>,
    %64 = vector.extract_strided_slice %7 {offsets = [7, 0, 0], sizes = [1, 8, 32], strides = [1, 1, 1]} : vector<8x8x64xf32> to vector<1x8x32xf32>
    %65 = vector.shape_cast %64 : vector<1x8x32xf32> to vector<8x32xf32>
    %66 = vector.extract_strided_slice %7 {offsets = [0, 0, 32], sizes = [1, 8, 32], strides = [1, 1, 1]} : vector<8x8x64xf32> to vector<1x8x32xf32>
    %67 = vector.shape_cast %66 : vector<1x8x32xf32> to vector<8x32xf32>
    %68 = tpu.concatenate %65, %67 in 1 : vector<8x32xf32>, vector<8x32xf32> -> vector<8x64xf32>
    %c7 = arith.constant 7 : index
    %c0_21 = arith.constant 0 : index
    %c0_22 = arith.constant 0 : index
    %69 = vector.load %arg7[%c7, %c0_21, %c0_22] : memref<8x8x64xf32, #tpu.memory_space<vmem>>, vector<1x8x64xf32>
    %70 = vector.shape_cast %69 : vector<1x8x64xf32> to vector<8x64xf32>
    %71 = vector.shape_cast %68 : vector<8x64xf32> to vector<1x8x64xf32>
    tpu.vector_store %arg7[%c7, %c0_21, %c0_22], %71 {strides = array<i32>} : memref<8x8x64xf32, #tpu.memory_space<vmem>>, vector<1x8x64xf32>,
    %c0_23 = arith.constant 0 : index
    %c0_24 = arith.constant 0 : index
    %72 = vector.load %arg2[%c0_23, %c0_24] : memref<8x64xf32, #tpu.memory_space<vmem>>, vector<8x64xf32>
    %c0_i32 = arith.constant 0 : i32
    %73 = arith.index_cast %c0_i32 : i32 to index
    %c0_25 = arith.constant 0 : index
    %c0_26 = arith.constant 0 : index
    %74 = vector.load %arg7[%73, %c0_25, %c0_26] : memref<8x8x64xf32, #tpu.memory_space<vmem>>, vector<1x8x64xf32>
    %75 = vector.shape_cast %74 : vector<1x8x64xf32> to vector<8x64xf32>
    %c0_27 = arith.constant 0 : index
    %c0_28 = arith.constant 0 : index
    %76 = vector.load %arg5[%c0_27, %c0_28] : memref<64x64xf32, #tpu.memory_space<vmem>>, vector<64x64xf32>
    %cst_29 = arith.constant dense<0.000000e+00> : vector<8x64xf32>
    %77 = tpu.matmul %72, %76, %cst_29 {dimension_numbers = #tpu.dot_dimension_numbers<[1], [0], [0], [1], [0, 0, 1, 1], [], []>} : vector<8x64xf32>, vector<64x64xf32>, vector<8x64xf32> -> vector<8x64xf32>
    %78 = arith.addf %75, %77 : vector<8x64xf32>
    %79 = math.tanh %78 : vector<8x64xf32>
    %80 = arith.index_cast %c0_i32 : i32 to index
    %c0_30 = arith.constant 0 : index
    %c0_31 = arith.constant 0 : index
    %81 = vector.load %arg7[%80, %c0_30, %c0_31] : memref<8x8x64xf32, #tpu.memory_space<vmem>>, vector<1x8x64xf32>
    %82 = vector.shape_cast %81 : vector<1x8x64xf32> to vector<8x64xf32>
    %83 = vector.shape_cast %79 : vector<8x64xf32> to vector<1x8x64xf32>
    tpu.vector_store %arg7[%80, %c0_30, %c0_31], %83 {strides = array<i32>} : memref<8x8x64xf32, #tpu.memory_space<vmem>>, vector<1x8x64xf32>,
    %c1_i32 = arith.constant 1 : i32
    %84 = arith.index_cast %c1_i32 : i32 to index
    %c0_32 = arith.constant 0 : index
    %c0_33 = arith.constant 0 : index
    %85 = vector.load %arg7[%84, %c0_32, %c0_33] : memref<8x8x64xf32, #tpu.memory_space<vmem>>, vector<1x8x64xf32>
    %86 = vector.shape_cast %85 : vector<1x8x64xf32> to vector<8x64xf32>
    %c0_34 = arith.constant 0 : index
    %c0_35 = arith.constant 0 : index
    %87 = vector.load %arg5[%c0_34, %c0_35] : memref<64x64xf32, #tpu.memory_space<vmem>>, vector<64x64xf32>
    %cst_36 = arith.constant dense<0.000000e+00> : vector<8x64xf32>
    %88 = tpu.matmul %79, %87, %cst_36 {dimension_numbers = #tpu.dot_dimension_numbers<[1], [0], [0], [1], [0, 0, 1, 1], [], []>} : vector<8x64xf32>, vector<64x64xf32>, vector<8x64xf32> -> vector<8x64xf32>
    %89 = arith.addf %86, %88 : vector<8x64xf32>
    %90 = math.tanh %89 : vector<8x64xf32>
    %91 = arith.index_cast %c1_i32 : i32 to index
    %c0_37 = arith.constant 0 : index
    %c0_38 = arith.constant 0 : index
    %92 = vector.load %arg7[%91, %c0_37, %c0_38] : memref<8x8x64xf32, #tpu.memory_space<vmem>>, vector<1x8x64xf32>
    %93 = vector.shape_cast %92 : vector<1x8x64xf32> to vector<8x64xf32>
    %94 = vector.shape_cast %90 : vector<8x64xf32> to vector<1x8x64xf32>
    tpu.vector_store %arg7[%91, %c0_37, %c0_38], %94 {strides = array<i32>} : memref<8x8x64xf32, #tpu.memory_space<vmem>>, vector<1x8x64xf32>,
    %c2_i32 = arith.constant 2 : i32
    %95 = arith.index_cast %c2_i32 : i32 to index
    %c0_39 = arith.constant 0 : index
    %c0_40 = arith.constant 0 : index
    %96 = vector.load %arg7[%95, %c0_39, %c0_40] : memref<8x8x64xf32, #tpu.memory_space<vmem>>, vector<1x8x64xf32>
    %97 = vector.shape_cast %96 : vector<1x8x64xf32> to vector<8x64xf32>
    %c0_41 = arith.constant 0 : index
    %c0_42 = arith.constant 0 : index
    %98 = vector.load %arg5[%c0_41, %c0_42] : memref<64x64xf32, #tpu.memory_space<vmem>>, vector<64x64xf32>
    %cst_43 = arith.constant dense<0.000000e+00> : vector<8x64xf32>
    %99 = tpu.matmul %90, %98, %cst_43 {dimension_numbers = #tpu.dot_dimension_numbers<[1], [0], [0], [1], [0, 0, 1, 1], [], []>} : vector<8x64xf32>, vector<64x64xf32>, vector<8x64xf32> -> vector<8x64xf32>
    %100 = arith.addf %97, %99 : vector<8x64xf32>
    %101 = math.tanh %100 : vector<8x64xf32>
    %102 = arith.index_cast %c2_i32 : i32 to index
    %c0_44 = arith.constant 0 : index
    %c0_45 = arith.constant 0 : index
    %103 = vector.load %arg7[%102, %c0_44, %c0_45] : memref<8x8x64xf32, #tpu.memory_space<vmem>>, vector<1x8x64xf32>
    %104 = vector.shape_cast %103 : vector<1x8x64xf32> to vector<8x64xf32>
    %105 = vector.shape_cast %101 : vector<8x64xf32> to vector<1x8x64xf32>
    tpu.vector_store %arg7[%102, %c0_44, %c0_45], %105 {strides = array<i32>} : memref<8x8x64xf32, #tpu.memory_space<vmem>>, vector<1x8x64xf32>,
    %c3_i32 = arith.constant 3 : i32
    %106 = arith.index_cast %c3_i32 : i32 to index
    %c0_46 = arith.constant 0 : index
    %c0_47 = arith.constant 0 : index
    %107 = vector.load %arg7[%106, %c0_46, %c0_47] : memref<8x8x64xf32, #tpu.memory_space<vmem>>, vector<1x8x64xf32>
    %108 = vector.shape_cast %107 : vector<1x8x64xf32> to vector<8x64xf32>
    %c0_48 = arith.constant 0 : index
    %c0_49 = arith.constant 0 : index
    %109 = vector.load %arg5[%c0_48, %c0_49] : memref<64x64xf32, #tpu.memory_space<vmem>>, vector<64x64xf32>
    %cst_50 = arith.constant dense<0.000000e+00> : vector<8x64xf32>
    %110 = tpu.matmul %101, %109, %cst_50 {dimension_numbers = #tpu.dot_dimension_numbers<[1], [0], [0], [1], [0, 0, 1, 1], [], []>} : vector<8x64xf32>, vector<64x64xf32>, vector<8x64xf32> -> vector<8x64xf32>
    %111 = arith.addf %108, %110 : vector<8x64xf32>
    %112 = math.tanh %111 : vector<8x64xf32>
    %113 = arith.index_cast %c3_i32 : i32 to index
    %c0_51 = arith.constant 0 : index
    %c0_52 = arith.constant 0 : index
    %114 = vector.load %arg7[%113, %c0_51, %c0_52] : memref<8x8x64xf32, #tpu.memory_space<vmem>>, vector<1x8x64xf32>
    %115 = vector.shape_cast %114 : vector<1x8x64xf32> to vector<8x64xf32>
    %116 = vector.shape_cast %112 : vector<8x64xf32> to vector<1x8x64xf32>
    tpu.vector_store %arg7[%113, %c0_51, %c0_52], %116 {strides = array<i32>} : memref<8x8x64xf32, #tpu.memory_space<vmem>>, vector<1x8x64xf32>,
    %c4_i32 = arith.constant 4 : i32
    %117 = arith.index_cast %c4_i32 : i32 to index
    %c0_53 = arith.constant 0 : index
    %c0_54 = arith.constant 0 : index
    %118 = vector.load %arg7[%117, %c0_53, %c0_54] : memref<8x8x64xf32, #tpu.memory_space<vmem>>, vector<1x8x64xf32>
    %119 = vector.shape_cast %118 : vector<1x8x64xf32> to vector<8x64xf32>
    %c0_55 = arith.constant 0 : index
    %c0_56 = arith.constant 0 : index
    %120 = vector.load %arg5[%c0_55, %c0_56] : memref<64x64xf32, #tpu.memory_space<vmem>>, vector<64x64xf32>
    %cst_57 = arith.constant dense<0.000000e+00> : vector<8x64xf32>
    %121 = tpu.matmul %112, %120, %cst_57 {dimension_numbers = #tpu.dot_dimension_numbers<[1], [0], [0], [1], [0, 0, 1, 1], [], []>} : vector<8x64xf32>, vector<64x64xf32>, vector<8x64xf32> -> vector<8x64xf32>
    %122 = arith.addf %119, %121 : vector<8x64xf32>
    %123 = math.tanh %122 : vector<8x64xf32>
    %124 = arith.index_cast %c4_i32 : i32 to index
    %c0_58 = arith.constant 0 : index
    %c0_59 = arith.constant 0 : index
    %125 = vector.load %arg7[%124, %c0_58, %c0_59] : memref<8x8x64xf32, #tpu.memory_space<vmem>>, vector<1x8x64xf32>
    %126 = vector.shape_cast %125 : vector<1x8x64xf32> to vector<8x64xf32>
    %127 = vector.shape_cast %123 : vector<8x64xf32> to vector<1x8x64xf32>
    tpu.vector_store %arg7[%124, %c0_58, %c0_59], %127 {strides = array<i32>} : memref<8x8x64xf32, #tpu.memory_space<vmem>>, vector<1x8x64xf32>,
    %c5_i32 = arith.constant 5 : i32
    %128 = arith.index_cast %c5_i32 : i32 to index
    %c0_60 = arith.constant 0 : index
    %c0_61 = arith.constant 0 : index
    %129 = vector.load %arg7[%128, %c0_60, %c0_61] : memref<8x8x64xf32, #tpu.memory_space<vmem>>, vector<1x8x64xf32>
    %130 = vector.shape_cast %129 : vector<1x8x64xf32> to vector<8x64xf32>
    %c0_62 = arith.constant 0 : index
    %c0_63 = arith.constant 0 : index
    %131 = vector.load %arg5[%c0_62, %c0_63] : memref<64x64xf32, #tpu.memory_space<vmem>>, vector<64x64xf32>
    %cst_64 = arith.constant dense<0.000000e+00> : vector<8x64xf32>
    %132 = tpu.matmul %123, %131, %cst_64 {dimension_numbers = #tpu.dot_dimension_numbers<[1], [0], [0], [1], [0, 0, 1, 1], [], []>} : vector<8x64xf32>, vector<64x64xf32>, vector<8x64xf32> -> vector<8x64xf32>
    %133 = arith.addf %130, %132 : vector<8x64xf32>
    %134 = math.tanh %133 : vector<8x64xf32>
    %135 = arith.index_cast %c5_i32 : i32 to index
    %c0_65 = arith.constant 0 : index
    %c0_66 = arith.constant 0 : index
    %136 = vector.load %arg7[%135, %c0_65, %c0_66] : memref<8x8x64xf32, #tpu.memory_space<vmem>>, vector<1x8x64xf32>
    %137 = vector.shape_cast %136 : vector<1x8x64xf32> to vector<8x64xf32>
    %138 = vector.shape_cast %134 : vector<8x64xf32> to vector<1x8x64xf32>
    tpu.vector_store %arg7[%135, %c0_65, %c0_66], %138 {strides = array<i32>} : memref<8x8x64xf32, #tpu.memory_space<vmem>>, vector<1x8x64xf32>,
    %c6_i32 = arith.constant 6 : i32
    %139 = arith.index_cast %c6_i32 : i32 to index
    %c0_67 = arith.constant 0 : index
    %c0_68 = arith.constant 0 : index
    %140 = vector.load %arg7[%139, %c0_67, %c0_68] : memref<8x8x64xf32, #tpu.memory_space<vmem>>, vector<1x8x64xf32>
    %141 = vector.shape_cast %140 : vector<1x8x64xf32> to vector<8x64xf32>
    %c0_69 = arith.constant 0 : index
    %c0_70 = arith.constant 0 : index
    %142 = vector.load %arg5[%c0_69, %c0_70] : memref<64x64xf32, #tpu.memory_space<vmem>>, vector<64x64xf32>
    %cst_71 = arith.constant dense<0.000000e+00> : vector<8x64xf32>
    %143 = tpu.matmul %134, %142, %cst_71 {dimension_numbers = #tpu.dot_dimension_numbers<[1], [0], [0], [1], [0, 0, 1, 1], [], []>} : vector<8x64xf32>, vector<64x64xf32>, vector<8x64xf32> -> vector<8x64xf32>
    %144 = arith.addf %141, %143 : vector<8x64xf32>
    %145 = math.tanh %144 : vector<8x64xf32>
    %146 = arith.index_cast %c6_i32 : i32 to index
    %c0_72 = arith.constant 0 : index
    %c0_73 = arith.constant 0 : index
    %147 = vector.load %arg7[%146, %c0_72, %c0_73] : memref<8x8x64xf32, #tpu.memory_space<vmem>>, vector<1x8x64xf32>
    %148 = vector.shape_cast %147 : vector<1x8x64xf32> to vector<8x64xf32>
    %149 = vector.shape_cast %145 : vector<8x64xf32> to vector<1x8x64xf32>
    tpu.vector_store %arg7[%146, %c0_72, %c0_73], %149 {strides = array<i32>} : memref<8x8x64xf32, #tpu.memory_space<vmem>>, vector<1x8x64xf32>,
    %c7_i32 = arith.constant 7 : i32
    %150 = arith.index_cast %c7_i32 : i32 to index
    %c0_74 = arith.constant 0 : index
    %c0_75 = arith.constant 0 : index
    %151 = vector.load %arg7[%150, %c0_74, %c0_75] : memref<8x8x64xf32, #tpu.memory_space<vmem>>, vector<1x8x64xf32>
    %152 = vector.shape_cast %151 : vector<1x8x64xf32> to vector<8x64xf32>
    %c0_76 = arith.constant 0 : index
    %c0_77 = arith.constant 0 : index
    %153 = vector.load %arg5[%c0_76, %c0_77] : memref<64x64xf32, #tpu.memory_space<vmem>>, vector<64x64xf32>
    %cst_78 = arith.constant dense<0.000000e+00> : vector<8x64xf32>
    %154 = tpu.matmul %145, %153, %cst_78 {dimension_numbers = #tpu.dot_dimension_numbers<[1], [0], [0], [1], [0, 0, 1, 1], [], []>} : vector<8x64xf32>, vector<64x64xf32>, vector<8x64xf32> -> vector<8x64xf32>
    %155 = arith.addf %152, %154 : vector<8x64xf32>
    %156 = math.tanh %155 : vector<8x64xf32>
    %157 = arith.index_cast %c7_i32 : i32 to index
    %c0_79 = arith.constant 0 : index
    %c0_80 = arith.constant 0 : index
    %158 = vector.load %arg7[%157, %c0_79, %c0_80] : memref<8x8x64xf32, #tpu.memory_space<vmem>>, vector<1x8x64xf32>
    %159 = vector.shape_cast %158 : vector<1x8x64xf32> to vector<8x64xf32>
    %160 = vector.shape_cast %156 : vector<8x64xf32> to vector<1x8x64xf32>
    tpu.vector_store %arg7[%157, %c0_79, %c0_80], %160 {strides = array<i32>} : memref<8x8x64xf32, #tpu.memory_space<vmem>>, vector<1x8x64xf32>,
    %c8_i32 = arith.constant 8 : i32
    %c0_81 = arith.constant 0 : index
    %c0_82 = arith.constant 0 : index
    %c0_83 = arith.constant 0 : index
    %161 = vector.load %arg7[%c0_81, %c0_82, %c0_83] : memref<8x8x64xf32, #tpu.memory_space<vmem>>, vector<1x8x32xf32>
    %162 = vector.shape_cast %161 : vector<1x8x32xf32> to vector<8x32xf32>
    %c7_84 = arith.constant 7 : index
    %c0_85 = arith.constant 0 : index
    %c32 = arith.constant 32 : index
    %163 = vector.load %arg7[%c7_84, %c0_85, %c32] : memref<8x8x64xf32, #tpu.memory_space<vmem>>, vector<1x8x32xf32>
    %164 = vector.shape_cast %163 : vector<1x8x32xf32> to vector<8x32xf32>
    %165 = arith.addf %162, %164 : vector<8x32xf32>
    %c1_86 = arith.constant 1 : index
    %c0_87 = arith.constant 0 : index
    %c0_88 = arith.constant 0 : index
    %166 = vector.load %arg7[%c1_86, %c0_87, %c0_88] : memref<8x8x64xf32, #tpu.memory_space<vmem>>, vector<1x8x32xf32>
    %167 = vector.shape_cast %166 : vector<1x8x32xf32> to vector<8x32xf32>
    %c6_89 = arith.constant 6 : index
    %c0_90 = arith.constant 0 : index
    %c32_91 = arith.constant 32 : index
    %168 = vector.load %arg7[%c6_89, %c0_90, %c32_91] : memref<8x8x64xf32, #tpu.memory_space<vmem>>, vector<1x8x32xf32>
    %169 = vector.shape_cast %168 : vector<1x8x32xf32> to vector<8x32xf32>
    %170 = arith.addf %167, %169 : vector<8x32xf32>
    %c2_92 = arith.constant 2 : index
    %c0_93 = arith.constant 0 : index
    %c0_94 = arith.constant 0 : index
    %171 = vector.load %arg7[%c2_92, %c0_93, %c0_94] : memref<8x8x64xf32, #tpu.memory_space<vmem>>, vector<1x8x32xf32>
    %172 = vector.shape_cast %171 : vector<1x8x32xf32> to vector<8x32xf32>
    %c5_95 = arith.constant 5 : index
    %c0_96 = arith.constant 0 : index
    %c32_97 = arith.constant 32 : index
    %173 = vector.load %arg7[%c5_95, %c0_96, %c32_97] : memref<8x8x64xf32, #tpu.memory_space<vmem>>, vector<1x8x32xf32>
    %174 = vector.shape_cast %173 : vector<1x8x32xf32> to vector<8x32xf32>
    %175 = arith.addf %172, %174 : vector<8x32xf32>
    %c3_98 = arith.constant 3 : index
    %c0_99 = arith.constant 0 : index
    %c0_100 = arith.constant 0 : index
    %176 = vector.load %arg7[%c3_98, %c0_99, %c0_100] : memref<8x8x64xf32, #tpu.memory_space<vmem>>, vector<1x8x32xf32>
    %177 = vector.shape_cast %176 : vector<1x8x32xf32> to vector<8x32xf32>
    %c4_101 = arith.constant 4 : index
    %c0_102 = arith.constant 0 : index
    %c32_103 = arith.constant 32 : index
    %178 = vector.load %arg7[%c4_101, %c0_102, %c32_103] : memref<8x8x64xf32, #tpu.memory_space<vmem>>, vector<1x8x32xf32>
    %179 = vector.shape_cast %178 : vector<1x8x32xf32> to vector<8x32xf32>
    %180 = arith.addf %177, %179 : vector<8x32xf32>
    %c4_104 = arith.constant 4 : index
    %c0_105 = arith.constant 0 : index
    %c0_106 = arith.constant 0 : index
    %181 = vector.load %arg7[%c4_104, %c0_105, %c0_106] : memref<8x8x64xf32, #tpu.memory_space<vmem>>, vector<1x8x32xf32>
    %182 = vector.shape_cast %181 : vector<1x8x32xf32> to vector<8x32xf32>
    %c3_107 = arith.constant 3 : index
    %c0_108 = arith.constant 0 : index
    %c32_109 = arith.constant 32 : index
    %183 = vector.load %arg7[%c3_107, %c0_108, %c32_109] : memref<8x8x64xf32, #tpu.memory_space<vmem>>, vector<1x8x32xf32>
    %184 = vector.shape_cast %183 : vector<1x8x32xf32> to vector<8x32xf32>
    %185 = arith.addf %182, %184 : vector<8x32xf32>
    %c5_110 = arith.constant 5 : index
    %c0_111 = arith.constant 0 : index
    %c0_112 = arith.constant 0 : index
    %186 = vector.load %arg7[%c5_110, %c0_111, %c0_112] : memref<8x8x64xf32, #tpu.memory_space<vmem>>, vector<1x8x32xf32>
    %187 = vector.shape_cast %186 : vector<1x8x32xf32> to vector<8x32xf32>
    %c2_113 = arith.constant 2 : index
    %c0_114 = arith.constant 0 : index
    %c32_115 = arith.constant 32 : index
    %188 = vector.load %arg7[%c2_113, %c0_114, %c32_115] : memref<8x8x64xf32, #tpu.memory_space<vmem>>, vector<1x8x32xf32>
    %189 = vector.shape_cast %188 : vector<1x8x32xf32> to vector<8x32xf32>
    %190 = arith.addf %187, %189 : vector<8x32xf32>
    %c6_116 = arith.constant 6 : index
    %c0_117 = arith.constant 0 : index
    %c0_118 = arith.constant 0 : index
    %191 = vector.load %arg7[%c6_116, %c0_117, %c0_118] : memref<8x8x64xf32, #tpu.memory_space<vmem>>, vector<1x8x32xf32>
    %192 = vector.shape_cast %191 : vector<1x8x32xf32> to vector<8x32xf32>
    %c1_119 = arith.constant 1 : index
    %c0_120 = arith.constant 0 : index
    %c32_121 = arith.constant 32 : index
    %193 = vector.load %arg7[%c1_119, %c0_120, %c32_121] : memref<8x8x64xf32, #tpu.memory_space<vmem>>, vector<1x8x32xf32>
    %194 = vector.shape_cast %193 : vector<1x8x32xf32> to vector<8x32xf32>
    %195 = arith.addf %192, %194 : vector<8x32xf32>
    %c7_122 = arith.constant 7 : index
    %c0_123 = arith.constant 0 : index
    %c0_124 = arith.constant 0 : index
    %196 = vector.load %arg7[%c7_122, %c0_123, %c0_124] : memref<8x8x64xf32, #tpu.memory_space<vmem>>, vector<1x8x32xf32>
    %197 = vector.shape_cast %196 : vector<1x8x32xf32> to vector<8x32xf32>
    %c0_125 = arith.constant 0 : index
    %c0_126 = arith.constant 0 : index
    %c32_127 = arith.constant 32 : index
    %198 = vector.load %arg7[%c0_125, %c0_126, %c32_127] : memref<8x8x64xf32, #tpu.memory_space<vmem>>, vector<1x8x32xf32>
    %199 = vector.shape_cast %198 : vector<1x8x32xf32> to vector<8x32xf32>
    %200 = arith.addf %197, %199 : vector<8x32xf32>
    %201 = tpu.concatenate %165, %170, %175, %180, %185, %190, %195, %200 in 1 : vector<8x32xf32>, vector<8x32xf32>, vector<8x32xf32>, vector<8x32xf32>, vector<8x32xf32>, vector<8x32xf32>, vector<8x32xf32>, vector<8x32xf32> -> vector<8x256xf32>
    %c0_128 = arith.constant 0 : index
    %c0_129 = arith.constant 0 : index
    %202 = vector.load %arg6[%c0_128, %c0_129] : memref<8x256xf32, #tpu.memory_space<vmem>>, vector<8x256xf32>
    tpu.vector_store %arg6[%c0_128, %c0_129], %201 {strides = array<i32>} : memref<8x256xf32, #tpu.memory_space<vmem>>, vector<8x256xf32>,
    return
  }
  func.func @transform_0(%arg0: i32) -> (i32, i32, i32) {
    %c0_i32 = arith.constant 0 : i32
    %c0_i32_0 = arith.constant 0 : i32
    %c0_i32_1 = arith.constant 0 : i32
    return %c0_i32, %arg0, %c0_i32_0 : i32, i32, i32
  }
  func.func @transform_1(%arg0: i32) -> (i32, i32) {
    %c0_i32 = arith.constant 0 : i32
    %c0_i32_0 = arith.constant 0 : i32
    return %arg0, %c0_i32 : i32, i32
  }
  func.func @transform_2(%arg0: i32) -> (i32, i32) {
    %c0_i32 = arith.constant 0 : i32
    %c0_i32_0 = arith.constant 0 : i32
    %c0_i32_1 = arith.constant 0 : i32
    return %c0_i32, %c0_i32_0 : i32, i32
  }
  func.func @transform_3(%arg0: i32) -> (i32, i32) {
    %c0_i32 = arith.constant 0 : i32
    %c0_i32_0 = arith.constant 0 : i32
    %c0_i32_1 = arith.constant 0 : i32
    return %c0_i32, %c0_i32_0 : i32, i32
  }
  func.func @transform_4(%arg0: i32) -> (i32, i32) {
    %c0_i32 = arith.constant 0 : i32
    %c0_i32_0 = arith.constant 0 : i32
    %c0_i32_1 = arith.constant 0 : i32
    return %c0_i32, %c0_i32_0 : i32, i32
  }
  func.func @transform_5(%arg0: i32) -> (i32, i32) {
    %c0_i32 = arith.constant 0 : i32
    %c0_i32_0 = arith.constant 0 : i32
    return %arg0, %c0_i32 : i32, i32
  }
}

</mosaic_0001>

<bundles_post_ra>
// kernel: rnn_layer_sum.1
= control target key start
LH: loop header
LB: loop body
LE: loop exit
PB: predicated region body
PF: predicated region fallthrough
CT: control target
= control target key end

     0   :  { %vm37_vm0 = vcmask 130048   ;;  %v1347_v3 = vmov 0.0|0.0   ;;  %vm1348_vm1 = vmmov 0   ;;  %v1349_v4 = vmov 0.0   ;;  %s1351_s28 = smov 32   ;;  %s1352_s29 = smov 64   ;;  %s1599_s2 = inlined_call_operand.vmem [shape: f32[16,64], index: 2, kind: input, shape index: {}]   ;;  %s1600_s0 = inlined_call_operand.vmem [shape: f32[8,8,16], index: 0, kind: input, shape index: {}]   ;;  %s1601_s4 = inlined_call_operand.vmem [shape: f32[64,64], index: 4, kind: input, shape index: {}]   ;;  %s1602_s1 = inlined_call_operand.vmem [shape: f32[8,64], index: 1, kind: input, shape index: {}]   ;;  %s1603_s3 = inlined_call_operand.vmem [shape: f32[1,64], index: 3, kind: input, shape index: {}]   ;;  %s1604_s5 = inlined_call_operand.vmem [shape: f32[8,256], index: 5, kind: output, shape index: {}]  }
   0x1   :  { %v28_v0 = vld [vmem:[%s1599_s2] sm:$0xff]  ;;  %v29_v1 = vld [vmem:[%s1599_s2 + $0x8] sm:$0xff]  ;;  %1229 = vmatprep.subr.bf16.mxu1 %v1347_v3  ;;  %1089 = vmatprep.mubr.msk.f32.mxu1 %vm1348_vm1, %v1349_v4  ;;  %v196_v9 = vld [vmem:[%s1601_s4 + $0x10] sm:$0xff]  ;;  %vm169_vm2 = vcmask 523264   ;;  %vm167_vm3 = vcmask 261120   ;;  %vm947_vm4 = vcmask 785408  }
   0x2   :  { %v20_v2 = vld [vmem:[%s1600_s0] sm:$0xff]  ;;  %v1225_v5 = vpack.c.bf16 %v29_v1, %v28_v0  ;;  %v195_v7 = vld [vmem:[%s1601_s4 + $0x8] sm:$0xff]  ;;  %v197_v11 = vld [vmem:[%s1601_s4 + $0x18] sm:$0xff] }
   0x3   :  { %1061 = vmatprep.mubr.msk.f32.mxu0 %vm37_vm0, %v20_v2  ;;  %v194_v6 = vld [vmem:[%s1601_s4] sm:$0xff]  ;;  %v21_v10 = vld [vmem:[%s1600_s0 + $0x8] sm:$0xff]  ;;  %v22_v12 = vld [vmem:[%s1600_s0 + $0x10] sm:$0xff]  ;;  %v1417_v13 = vpack.c.bf16 %v197_v11, %v196_v9 }
   0x4   :  { %1226 = vmatprep.subr.bf16.mxu0 %v1225_v5  ;;  %v1402_v8 = vpack.c.bf16 %v195_v7, %v194_v6  ;;  %v198_v14 = vld [vmem:[%s1601_s4 + $0x20] sm:$0xff]  ;;  %v199_v15 = vld [vmem:[%s1601_s4 + $0x28] sm:$0xff]  ;;  %v23_v16 = vld [vmem:[%s1600_s0 + $0x18] sm:$0xff] }
   0x5   :  { %1228 = vmatpush3.bf16.msra.mxu0 %v1225_v5  ;;  %v24_v17 = vld [vmem:[%s1600_s0 + $0x20] sm:$0xff]  ;;  %v1437_v18 = vpack.c.bf16 %v199_v15, %v198_v14  ;;  %v200_v19 = vld [vmem:[%s1601_s4 + $0x30] sm:$0xff]  ;;  %v201_v20 = vld [vmem:[%s1601_s4 + $0x38] sm:$0xff] }
   0x6   :  { %1231 = vmatpush3.bf16.msra.mxu1 %v1402_v8  ;;  %1241 = vmatprep.subr.bf16.mxu0 %v1347_v3  ;;  %v25_v21 = vld [vmem:[%s1600_s0 + $0x28] sm:$0xff]  ;;  %v26_v22 = vld [vmem:[%s1600_s0 + $0x30] sm:$0xff]  ;;  %v1457_v23 = vpack.c.bf16 %v201_v20, %v200_v19  ;;  %v27_v24 = vld [vmem:[%s1600_s0 + $0x38] sm:$0xff] }
   0x7   :  { %1232 = vmatprep.subr.bf16.mxu1 %v1347_v3  ;;  %v192_v25 = vld [vmem:[%s1602_s1] sm:$0xff] }
   0x8   :  { %1062 = vmatmul.mubr.msk.f32.vlgmr.msra.gmra.mrb[0].mxu0 %vm37_vm0, %v21_v10  ;;  %v958_v30 = vld [vmem:[%s1603_s3] ss:$0 sm:$0xff]  ;;  %s1350_s3 = smov 96  }
   0x9   :  { %1064 = vmatprep.mubr.msk.f32.mxu0 %vm37_vm0, %v22_v12  ;;  %1243 = vmatpush3.bf16.msra.mxu0 %v1402_v8 }
   0xa   :  { %1234 = vmatpush3.bf16.msra.mxu1 %v1417_v13  ;;  %1244 = vmatprep.subr.bf16.mxu0 %v1347_v3 }
   0xb   :  { %1235 = vmatprep.subr.bf16.mxu1 %v1347_v3 }
   0xc   :  { %1065 = vmatmul.mubr.msk.f32.gmra.mrb[2].mxu0 %vm37_vm0, %v23_v16 }
   0xd   :  { %1067 = vmatprep.mubr.msk.f32.mxu0 %vm37_vm0, %v24_v17  ;;  %1246 = vmatpush3.bf16.msra.mxu0 %v1417_v13 }
   0xe   :  { %1237 = vmatpush3.bf16.msra.mxu1 %v1437_v18  ;;  %1247 = vmatprep.subr.bf16.mxu0 %v1347_v3 }
   0xf   :  { %1238 = vmatprep.subr.bf16.mxu1 %v1347_v3 }
  0x10   :  { %1068 = vmatmul.mubr.msk.f32.gmra.mrb[4].mxu0 %vm37_vm0, %v25_v21 }
  0x11   :  { %1070 = vmatprep.mubr.msk.f32.mxu0 %vm37_vm0, %v26_v22  ;;  %1249 = vmatpush3.bf16.msra.mxu0 %v1437_v18 }
  0x12   :  { %1240 = vmatpush3.bf16.msra.mxu1 %v1457_v23  ;;  %1250 = vmatprep.subr.bf16.mxu0 %v1347_v3 }
  0x13   :  { %1253 = vmatprep.subr.bf16.mxu1 %v1347_v3 }
  0x14   :  { %1071 = vmatmul.mubr.msk.f32.gmra.mrb[6].mxu0 %vm37_vm0, %v27_v24 }
  0x15   :  { %1090 = vmatmul.mubr.msk.f32.vlgmr.msra.gmra.mrb[0].mxu1 %vm169_vm2, %v192_v25  ;;  %1252 = vmatpush3.bf16.msra.mxu0 %v1457_v23 }
  0x16   :  { %1108 = vmatprep.mubr.msk.f32.mxu0 %vm1348_vm1, %v1349_v4  ;;  %1255 = vmatpush3.bf16.msra.mxu1 %v1402_v8 }
  0x17   :  { %1256 = vmatprep.subr.bf16.mxu1 %v1347_v3  ;;  %1127 = vmatprep.mubr.msk.f32.mxu1 %vm1348_vm1, %v1349_v4 }
  0x18   :  { %1265 = vmatprep.subr.bf16.mxu0 %v1347_v3 }
  0x1a   :  { %1258 = vmatpush3.bf16.msra.mxu1 %v1417_v13 }
  0x1b   :  { %1259 = vmatprep.subr.bf16.mxu1 %v1347_v3 }
  0x1e   :  { %1261 = vmatpush3.bf16.msra.mxu1 %v1437_v18 }
  0x1f   :  { %1262 = vmatprep.subr.bf16.mxu1 %v1347_v3 }
  0x22   :  { %1264 = vmatpush3.bf16.msra.mxu1 %v1457_v23 }
  0x23   :  { %1277 = vmatprep.subr.bf16.mxu1 %v1347_v3 }
  0xdb   :  { %v1063_v26 = vpop.f32.mrb[0].mxu0 }
  0xdc   :  { %v128_v27 = vpop.f32.mrb[1].mxu0  ;;  %v134_v46 = vadd.f32 %v1063_v26, %v958_v30 }
  0xdd   :  { %v129_v42 = vadd.f32 %v958_v30, %v128_v27 }
  0xdf   :  { %v1066_v28 = vpop.f32.mrb[2].mxu0 }
  0xe0   :  { %v138_v29 = vpop.f32.mrb[3].mxu0  ;;  %v144_v35 = vadd.f32 %v1066_v28, %v958_v30 }
  0xe1   :  { %v139_v32 = vadd.f32 %v958_v30, %v138_v29 }
  0xe3   :  { %v1069_v31 = vpop.f32.mrb[4].mxu0 }
  0xe4   :  { %v154_v33 = vadd.f32 %v1069_v31, %v958_v30  ;;  %v148_v34 = vpop.f32.mrb[5].mxu0 }
  0xe5   :  { %v149_v36 = vadd.f32 %v958_v30, %v148_v34 }
  0xe6   :  { %v174_v37 = vsel %vm167_vm3, %v139_v32, %v154_v33  ;;  %v183_v38 = vsel %vm167_vm3, %v154_v33, %v139_v32 }
  0xe7   :  { %176 = vst.msk [vmem:[#allocation2 + $0x10] sm:$0xff] %vm169_vm2, %v174_v37  ;;  %185 = vst.msk [vmem:[#allocation2 + $0x28] sm:$0xff] %vm169_vm2, %v183_v38  ;;  %v177_v39 = vsel %vm167_vm3, %v144_v35, %v149_v36  ;;  %v180_v40 = vsel %vm167_vm3, %v149_v36, %v144_v35  ;;  %v1072_v41 = vpop.f32.mrb[6].mxu0 }
  0xe8   :  { %179 = vst.msk [vmem:[#allocation2 + $0x18] sm:$0xff] %vm169_vm2, %v177_v39  ;;  %182 = vst.msk [vmem:[#allocation2 + $0x20] sm:$0xff] %vm169_vm2, %v180_v40  ;;  %v164_v43 = vadd.f32 %v1072_v41, %v958_v30  ;;  %v158_v44 = vpop.f32.mrb[7].mxu0  ;;  %v271_v45 = vpop.f32.mrb[0].mxu1 }
  0xe9   :  { %v159_v47 = vadd.f32 %v958_v30, %v158_v44  ;;  %v1091_v48 = vpop.f32.mrb[1].mxu1 }
  0xea   :  { %v168_v49 = vsel %vm167_vm3, %v129_v42, %v164_v43  ;;  %v189_v50 = vsel %vm167_vm3, %v164_v43, %v129_v42 }
  0xeb   :  { %170 = vst.msk [vmem:[#allocation2] sm:$0xff] %vm169_vm2, %v168_v49  ;;  %191 = vst.msk [vmem:[#allocation2 + $0x38] sm:$0xff] %vm169_vm2, %v189_v50  ;;  %v171_v51 = vsel %vm167_vm3, %v134_v46, %v159_v47  ;;  %v186_v52 = vsel %vm167_vm3, %v159_v47, %v134_v46 }
  0xec   :  { %173 = vst.msk [vmem:[#allocation2 + $0x8] sm:$0xff] %vm169_vm2, %v171_v51  ;;  %188 = vst.msk [vmem:[#allocation2 + $0x30] sm:$0xff] %vm169_vm2, %v186_v52 }
  0xee   :  { %v363_v62 = vld [vmem:[#allocation2 + $0x10] sm:$0xff]  ;;  %v618_v19 = vld [vmem:[#allocation2 + $0x28] sm:$0xff] }
  0xef   :  { %v448_v6 = vld [vmem:[#allocation2 + $0x18] sm:$0xff]  ;;  %v533_v12 = vld [vmem:[#allocation2 + $0x20] sm:$0xff] }
  0xf2   :  { %v193_v53 = vld [vmem:[#allocation2] sm:$0xff]  ;;  %v788_v37 = vld [vmem:[#allocation2 + $0x38] sm:$0xff] }
  0xf3   :  { %v275_v54 = vadd.f32 %v271_v45, %v193_v53  ;;  %v278_v56 = vld [vmem:[#allocation2 + $0x8] sm:$0xff]  ;;  %v703_v24 = vld [vmem:[#allocation2 + $0x30] sm:$0xff] }
  0xf5   :  { %1331 = vtanh.f32 %v275_v54 }
  0xff   :  { %v1332_v55 = vpop.eup %1331 }
 0x100   :  { %277 = vst.msk [vmem:[#allocation2] sm:$0xff] %vm169_vm2, %v1332_v55  ;;  %1109 = vmatmul.mubr.msk.f32.vlgmr.msra.gmra.mrb[8].mxu0 %vm169_vm2, %v1332_v55 }
 0x101   :  { %1267 = vmatpush3.bf16.msra.mxu0 %v1402_v8  ;;  %1146 = vmatprep.mubr.msk.f32.mxu0 %vm1348_vm1, %v1349_v4 }
 0x102   :  { %1268 = vmatprep.subr.bf16.mxu0 %v1347_v3 }
 0x105   :  { %1270 = vmatpush3.bf16.msra.mxu0 %v1417_v13 }
 0x106   :  { %1271 = vmatprep.subr.bf16.mxu0 %v1347_v3 }
 0x109   :  { %1273 = vmatpush3.bf16.msra.mxu0 %v1437_v18 }
 0x10a   :  { %1274 = vmatprep.subr.bf16.mxu0 %v1347_v3 }
 0x10d   :  { %1276 = vmatpush3.bf16.msra.mxu0 %v1457_v23 }
 0x10e   :  { %1289 = vmatprep.subr.bf16.mxu0 %v1347_v3 }
 0x1d3   :  { %v356_v57 = vpop.f32.mrb[8].mxu0 }
 0x1d4   :  { %v360_v58 = vadd.f32 %v356_v57, %v278_v56  ;;  %v1110_v59 = vpop.f32.mrb[9].mxu0 }
 0x1d6   :  { %1333 = vtanh.f32 %v360_v58 }
 0x1e0   :  { %v1334_v60 = vpop.eup %1333 }
 0x1e1   :  { %362 = vst.msk [vmem:[#allocation2 + $0x8] sm:$0xff] %vm169_vm2, %v1334_v60  ;;  %1128 = vmatmul.mubr.msk.f32.vlgmr.msra.gmra.mrb[2].mxu1 %vm169_vm2, %v1334_v60 }
 0x1e2   :  { %1279 = vmatpush3.bf16.msra.mxu1 %v1402_v8  ;;  %1165 = vmatprep.mubr.msk.f32.mxu1 %vm1348_vm1, %v1349_v4 }
 0x1e3   :  { %1280 = vmatprep.subr.bf16.mxu1 %v1347_v3 }
 0x1e6   :  { %1282 = vmatpush3.bf16.msra.mxu1 %v1417_v13 }
 0x1e7   :  { %1283 = vmatprep.subr.bf16.mxu1 %v1347_v3 }
 0x1e8   :  { %v1528_v61 = vld [vmem:[#allocation2 + $0x8] sm:$0xff] }
 0x1e9   :  { %912 = vrot.lane.b32.xlu1 %v1528_v61, %s1350_s3 }
 0x1ea   :  { %1285 = vmatpush3.bf16.msra.mxu1 %v1437_v18 }
 0x1eb   :  { %1286 = vmatprep.subr.bf16.mxu1 %v1347_v3 }
 0x1ee   :  { %1288 = vmatpush3.bf16.msra.mxu1 %v1457_v23 }
 0x1ef   :  { %1301 = vmatprep.subr.bf16.mxu1 %v1347_v3 }
 0x25b   :  { %v913_v29 = vpop.permute.xlu1 %912 }
 0x2b4   :  { %v441_v63 = vpop.f32.mrb[2].mxu1 }
 0x2b5   :  { %v445_v0 = vadd.f32 %v441_v63, %v363_v62  ;;  %v1129_v1 = vpop.f32.mrb[3].mxu1 }
 0x2b7   :  { %1335 = vtanh.f32 %v445_v0 }
 0x2c1   :  { %v1336_v2 = vpop.eup %1335 }
 0x2c2   :  { %447 = vst.msk [vmem:[#allocation2 + $0x10] sm:$0xff] %vm169_vm2, %v1336_v2  ;;  %1147 = vmatmul.mubr.msk.f32.vlgmr.msra.gmra.mrb[10].mxu0 %vm169_vm2, %v1336_v2 }
 0x2c3   :  { %1291 = vmatpush3.bf16.msra.mxu0 %v1402_v8  ;;  %1184 = vmatprep.mubr.msk.f32.mxu0 %vm1348_vm1, %v1349_v4 }
 0x2c4   :  { %1292 = vmatprep.subr.bf16.mxu0 %v1347_v3 }
 0x2c7   :  { %1294 = vmatpush3.bf16.msra.mxu0 %v1417_v13 }
 0x2c8   :  { %1295 = vmatprep.subr.bf16.mxu0 %v1347_v3 }
 0x2c9   :  { %v1544_v5 = vld [vmem:[#allocation2 + $0x10] sm:$0xff] }
 0x2ca   :  { %907 = vrot.lane.b32.xlu0 %v1544_v5, %s1350_s3 }
 0x2cb   :  { %1297 = vmatpush3.bf16.msra.mxu0 %v1437_v18 }
 0x2cc   :  { %1298 = vmatprep.subr.bf16.mxu0 %v1347_v3 }
 0x2cf   :  { %1300 = vmatpush3.bf16.msra.mxu0 %v1457_v23 }
 0x2d0   :  { %1313 = vmatprep.subr.bf16.mxu0 %v1347_v3 }
 0x395   :  { %v526_v7 = vpop.f32.mrb[10].mxu0 }
 0x396   :  { %v530_v9 = vadd.f32 %v526_v7, %v448_v6  ;;  %v1148_v10 = vpop.f32.mrb[11].mxu0 }
 0x398   :  { %1337 = vtanh.f32 %v530_v9 }
 0x3a2   :  { %v1338_v11 = vpop.eup %1337 }
 0x3a3   :  { %532 = vst.msk [vmem:[#allocation2 + $0x18] sm:$0xff] %vm169_vm2, %v1338_v11  ;;  %1166 = vmatmul.mubr.msk.f32.vlgmr.msra.gmra.mrb[4].mxu1 %vm169_vm2, %v1338_v11 }
 0x3a4   :  { %1303 = vmatpush3.bf16.msra.mxu1 %v1402_v8  ;;  %1203 = vmatprep.mubr.msk.f32.mxu1 %vm1348_vm1, %v1349_v4 }
 0x3a5   :  { %1304 = vmatprep.subr.bf16.mxu1 %v1347_v3 }
 0x3a8   :  { %1306 = vmatpush3.bf16.msra.mxu1 %v1417_v13 }
 0x3a9   :  { %1307 = vmatprep.subr.bf16.mxu1 %v1347_v3 }
 0x3ac   :  { %1309 = vmatpush3.bf16.msra.mxu1 %v1437_v18 }
 0x3ad   :  { %1310 = vmatprep.subr.bf16.mxu1 %v1347_v3 }
 0x3b0   :  { %1312 = vmatpush3.bf16.msra.mxu1 %v1457_v23 }
 0x476   :  { %v611_v14 = vpop.f32.mrb[4].mxu1 }
 0x477   :  { %v615_v15 = vadd.f32 %v611_v14, %v533_v12  ;;  %v1167_v16 = vpop.f32.mrb[5].mxu1 }
 0x479   :  { %1339 = vtanh.f32 %v615_v15 }
 0x483   :  { %v1340_v17 = vpop.eup %1339 }
 0x484   :  { %617 = vst.msk [vmem:[#allocation2 + $0x20] sm:$0xff] %vm169_vm2, %v1340_v17  ;;  %1185 = vmatmul.mubr.msk.f32.vlgmr.msra.gmra.mrb[12].mxu0 %vm169_vm2, %v1340_v17 }
 0x485   :  { %1315 = vmatpush3.bf16.msra.mxu0 %v1402_v8  ;;  %1222 = vmatprep.mubr.msk.f32.mxu0 %vm1348_vm1, %v1349_v4 }
 0x486   :  { %1316 = vmatprep.subr.bf16.mxu0 %v1347_v3 }
 0x489   :  { %1318 = vmatpush3.bf16.msra.mxu0 %v1417_v13  ;;  %v873_v13 = vld [vmem:[#allocation2] sm:$0xff] }
 0x48a   :  { %1319 = vmatprep.subr.bf16.mxu0 %v1347_v3 }
 0x48b   :  { %v895_v33 = vld [vmem:[#allocation2 + $0x20] sm:$0xff] }
 0x48d   :  { %1321 = vmatpush3.bf16.msra.mxu0 %v1437_v18  ;;  %v894_v18 = vld [vmem:[#allocation2 + $0x18] sm:$0xff] }
 0x48e   :  { %1322 = vmatprep.subr.bf16.mxu0 %v1347_v3  ;;  %v908_v3 = vpop.permute.xlu0 %907 }
 0x491   :  { %1324 = vmatpush3.bf16.msra.mxu0 %v1457_v23 }
 0x557   :  { %v696_v20 = vpop.f32.mrb[12].mxu0 }
 0x558   :  { %v700_v21 = vadd.f32 %v696_v20, %v618_v19  ;;  %v1186_v22 = vpop.f32.mrb[13].mxu0 }
 0x55a   :  { %1341 = vtanh.f32 %v700_v21 }
 0x564   :  { %v1342_v8 = vpop.eup %1341 }
 0x565   :  { %702 = vst.msk [vmem:[#allocation2 + $0x28] sm:$0xff] %vm169_vm2, %v1342_v8  ;;  %1204 = vmatmul.mubr.msk.f32.vlgmr.msra.gmra.mrb[6].mxu1 %vm169_vm2, %v1342_v8 }
 0x56c   :  { %v888_v4 = vld [vmem:[#allocation2 + $0x28] sm:$0xff] }
 0x56d   :  { %890 = vrot.lane.b32.xlu1 %v888_v4, %s1350_s3  ;;  %v910_v23 = vadd.f32 %v908_v3, %v888_v4 }
 0x571   :  { %917 = vrot.lane.b32.xlu1 %v873_v13, %s1350_s3 }
 0x575   :  { %902 = vrot.lane.b32.xlu1 %v894_v18, %s1350_s3 }
 0x579   :  { %934 = vrot.lane.b32.xlu1 %v910_v23, %s1351_s28 }
 0x5df   :  { %v891_v32 = vpop.permute.xlu1 %890 }
 0x5e0   :  { %v893_v34 = vadd.f32 %v891_v32, %v1544_v5 }
 0x5e3   :  { %v918_v42 = vpop.permute.xlu1 %917 }
 0x5e7   :  { %v903_v47 = vpop.permute.xlu1 %902 }
 0x5e8   :  { %v905_v52 = vadd.f32 %v903_v47, %v895_v33 }
 0x5eb   :  { %v935_v49 = vpop.permute.xlu1 %934 }
 0x5ec   :  { %v949_v54 = vsel %vm167_vm3, %v905_v52, %v935_v49 }
 0x638   :  { %v781_v25 = vpop.f32.mrb[6].mxu1 }
 0x639   :  { %v785_v26 = vadd.f32 %v781_v25, %v703_v24  ;;  %v1205_v27 = vpop.f32.mrb[7].mxu1 }
 0x63b   :  { %1343 = vtanh.f32 %v785_v26 }
 0x645   :  { %v1344_v28 = vpop.eup %1343 }
 0x646   :  { %787 = vst.msk [vmem:[#allocation2 + $0x30] sm:$0xff] %vm169_vm2, %v1344_v28  ;;  %1223 = vmatmul.mubr.msk.f32.vlgmr.msra.gmra.mrb[14].mxu0 %vm169_vm2, %v1344_v28 }
 0x64d   :  { %v881_v30 = vld [vmem:[#allocation2 + $0x30] sm:$0xff] }
 0x64e   :  { %883 = vrot.lane.b32.xlu0 %v881_v30, %s1350_s3  ;;  %v915_v31 = vadd.f32 %v913_v29, %v881_v30 }
 0x650   :  { %938 = vrot.lane.b32.xlu1 %v915_v31, %s1352_s29 }
 0x652   :  { %897 = vrot.lane.b32.xlu0 %v895_v33, %s1350_s3 }
 0x656   :  { %926 = vrot.lane.b32.xlu0 %v893_v34, %s1352_s29 }
 0x6c0   :  { %v884_v35 = vpop.permute.xlu0 %883 }
 0x6c1   :  { %v886_v36 = vadd.f32 %v884_v35, %v1528_v61 }
 0x6c2   :  { %v939_v51 = vpop.permute.xlu1 %938 }
 0x6c3   :  { %922 = vrot.lane.b32.xlu0 %v886_v36, %s1351_s28  ;;  %v950_v56 = vsel %vm169_vm2, %v949_v54, %v939_v51 }
 0x6c4   :  { %v898_v43 = vpop.permute.xlu0 %897 }
 0x6c5   :  { %v900_v46 = vadd.f32 %v898_v43, %v894_v18 }
 0x6c8   :  { %v927_v48 = vpop.permute.xlu0 %926 }
 0x719   :  { %v866_v38 = vpop.f32.mrb[14].mxu0 }
 0x71a   :  { %v870_v39 = vadd.f32 %v866_v38, %v788_v37  ;;  %v1224_v40 = vpop.f32.mrb[15].mxu0 }
 0x71c   :  { %1345 = vtanh.f32 %v870_v39 }
 0x726   :  { %v1346_v41 = vpop.eup %1345 }
 0x727   :  { %872 = vst.msk [vmem:[#allocation2 + $0x38] sm:$0xff] %vm169_vm2, %v1346_v41 }
 0x72e   :  { %v874_v44 = vld [vmem:[#allocation2 + $0x38] sm:$0xff] }
 0x72f   :  { %876 = vrot.lane.b32.xlu0 %v874_v44, %s1350_s3  ;;  %v920_v45 = vadd.f32 %v918_v42, %v874_v44 }
 0x731   :  { %942 = vrot.lane.b32.xlu1 %v920_v45, %s1350_s3 }
 0x733   :  { %930 = vrot.lane.b32.xlu0 %v900_v46, %s1350_s3 }
 0x735   :  { %v923_v50 = vpop.permute.xlu0 %922 }
 0x7a1   :  { %v877_v53 = vpop.permute.xlu0 %876 }
 0x7a2   :  { %v879_v55 = vadd.f32 %v877_v53, %v873_v13 }
 0x7a3   :  { %v943_v57 = vpop.permute.xlu1 %942 }
 0x7a4   :  { %v945_v58 = vsel %vm167_vm3, %v879_v55, %v923_v50  ;;  %v951_v59 = vsel %vm947_vm4, %v950_v56, %v943_v57 }
 0x7a5   :  { %953 = vst [vmem:[%s1604_s5 + $0x8] sm:$0xff] %v951_v59  ;;  %v931_v60 = vpop.permute.xlu0 %930  ;;  %v946_v61 = vsel %vm169_vm2, %v945_v58, %v927_v48 }
 0x7a6   :  { %v948_v62 = vsel %vm947_vm4, %v946_v61, %v931_v60 }
 0x7a7   :  { %952 = vst [vmem:[%s1604_s5] sm:$0xff] %v948_v62 }

</bundles_post_ra>
